<compile_context>
chip_gen: v5e
topology: v5e:2x2
jax: 0.10.0
libtpu: 0.0.40
codegen_flags: <defaults>
</compile_context>

<pallas_src>
import math

import jax
import jax.numpy as jnp
from jax.experimental import pallas as pl
from jax.experimental.pallas import tpu as pltpu


def _leaky_relu_kernel(x_ref, o_ref):
    x = x_ref[...]
    # leaky_relu(x) = x if x >= 0 else 0.01 * x   (matches torch semantics)
    o_ref[...] = jnp.where(x >= 0, x, x * jnp.asarray(0.01, dtype=x.dtype))


def leaky_relu(x: jax.Array, *, target_block_bytes: int = 2 * 1024 * 1024) -> jax.Array:
    """Elementwise LeakyReLU(0.01) matching torch.nn.functional.leaky_relu."""
    orig_shape = x.shape
    dtype = x.dtype
    total = int(math.prod(orig_shape)) if orig_shape else 1
    if total == 0:
        return x

    flat = x.reshape(-1)

    # Pad only to the next multiple of 128 (at most 127 elements, usually 0).
    pad = (-total) % 128
    if pad:
        flat = jnp.pad(flat, (0, pad))
    padded = total + pad

    # Widest lane-dense view whose last dim divides the flattened size.
    lane = 128
    for cand in (4096, 2048, 1024, 512, 256):
        if padded % cand == 0:
            lane = cand
            break
    rows = padded // lane
    x2d = flat.reshape(rows, lane)

    # ~2 MiB blocks: big enough to hit the HBM roofline, small enough that
    # 2x input + 2x output double buffers fit v5e/v7x scoped-VMEM defaults.
    itemsize = jnp.dtype(dtype).itemsize
    tile_rows = max(8, (target_block_bytes // (lane * itemsize)) // 8 * 8)
    if tile_rows >= rows:
        tile_rows = rows  # single block covering the whole (small) array
    grid = (pl.cdiv(rows, tile_rows),)

    out2d = pl.pallas_call(
        _leaky_relu_kernel,
        out_shape=jax.ShapeDtypeStruct((rows, lane), dtype),
        grid_spec=pltpu.PrefetchScalarGridSpec(
            num_scalar_prefetch=0,
            grid=grid,
            in_specs=[pl.BlockSpec((tile_rows, lane), lambda i: (i, 0))],
            out_specs=pl.BlockSpec((tile_rows, lane), lambda i: (i, 0)),
        ),
        compiler_params=pltpu.CompilerParams(
            dimension_semantics=("parallel",),
        ),
        input_output_aliases={0: 0},
    )(x2d)

    out_flat = out2d.reshape(-1)
    if pad:
        out_flat = out_flat[:total]
    return out_flat.reshape(orig_shape)


if __name__ == "__main__":
    key = jax.random.PRNGKey(0)

    # NCHW input consistent with a conv-autoencoder activation:
    # batch=2, channels=4, 16x16 spatial. Flattens to exactly 1 x 2048 -> no padding.
    x = jax.random.normal(key, (2, 4, 16, 16), dtype=jnp.float32)
    y = jax.block_until_ready(leaky_relu(x))
    y_ref = jnp.where(x >= 0, x, 0.01 * x)
    assert y.shape == x.shape and y.dtype == x.dtype
    assert bool(jnp.allclose(y, y_ref, atol=0.0, rtol=0.0))

    # Secondary check: odd-sized input exercising the (tiny) padded path.
    x2 = jax.random.normal(jax.random.PRNGKey(1), (3, 5, 7), dtype=jnp.float32)
    y2 = jax.block_until_ready(leaky_relu(x2))
    y2_ref = jnp.where(x2 >= 0, x2, 0.01 * x2)
    assert y2.shape == x2.shape and y2.dtype == x2.dtype
    assert bool(jnp.allclose(y2, y2_ref, atol=0.0, rtol=0.0))

    print("KERNEL_OK")
</pallas_src>

<mosaic_0001>
module attributes {stable_mosaic.version = 11 : i64} {
  func.func @_leaky_relu_kernel(%arg0: i32, %arg1: memref<1x2048xf32, #tpu.memory_space<vmem>>, %arg2: memref<1x2048xf32, #tpu.memory_space<vmem>>) attributes {dimension_semantics = [#tpu.dimension_semantics<parallel>], iteration_bounds = array<i64: 1>, scalar_prefetch = 0 : i64, scratch_operands = 0 : i64, tpu.core_type = #tpu.core_type<tc>, window_params = [{transform_indices = @transform_0, window_bounds = array<i64: 1, 2048>}, {transform_indices = @transform_1, window_bounds = array<i64: 1, 2048>}]} {
    %c0 = arith.constant 0 : index
    %c0_0 = arith.constant 0 : index
    %0 = vector.load %arg1[%c0, %c0_0] : memref<1x2048xf32, #tpu.memory_space<vmem>>, vector<1x2048xf32>
    %cst = arith.constant 0.000000e+00 : f32
    %1 = vector.broadcast %cst : f32 to vector<1x2048xf32>
    %2 = arith.cmpf oge, %0, %1 : vector<1x2048xf32>
    %cst_1 = arith.constant 0.00999999977 : f32
    %3 = vector.broadcast %cst_1 : f32 to vector<1x2048xf32>
    %4 = arith.mulf %0, %3 : vector<1x2048xf32>
    %5 = arith.select %2, %0, %4 : vector<1x2048xi1>, vector<1x2048xf32>
    %c0_2 = arith.constant 0 : index
    %c0_3 = arith.constant 0 : index
    %6 = vector.load %arg2[%c0_2, %c0_3] : memref<1x2048xf32, #tpu.memory_space<vmem>>, vector<1x2048xf32>
    tpu.vector_store %arg2[%c0_2, %c0_3], %5 {strides = array<i32>} : memref<1x2048xf32, #tpu.memory_space<vmem>>, vector<1x2048xf32>,
    return
  }
  func.func @transform_0(%arg0: i32) -> (i32, i32) {
    %c0_i32 = arith.constant 0 : i32
    %c0_i32_0 = arith.constant 0 : i32
    return %arg0, %c0_i32 : i32, i32
  }
  func.func @transform_1(%arg0: i32) -> (i32, i32) {
    %c0_i32 = arith.constant 0 : i32
    %c0_i32_0 = arith.constant 0 : i32
    return %arg0, %c0_i32 : i32, i32
  }
}

</mosaic_0001>

<bundles_post_ra>
// kernel: tpu_custom_call.1
= control target key start
LH: loop header
LB: loop body
LE: loop exit
PB: predicated region body
PF: predicated region fallthrough
CT: control target
= control target key end

     0   :  { %6 = vsyncpa [#allocation3], 0  ;;  %s122_s0 = inlined_call_operand.hbm [shape: f32[1,2048], index: 0, kind: input, shape index: {}, may-alias: {0,1}]   ;;  %s123_s1 = inlined_call_operand.hbm [shape: f32[1,2048], index: 1, kind: output, shape index: {}, may-alias: {0,1}]  }
   0x1   :  { %7 = vsyncpa [#allocation4], 0  ;;  %s13_s8 = sshll.u32 %s122_s0, 4  ;;  %s104_s9 = smov [#allocation2]   ;;  %s14_s8 = int_to_ptr.hbm [resolvable:$true] %s13_s8 }
   0x2   :  { %s15_s10 = sshll.u32 %s104_s9, 4  ;;  %s16_s10 = int_to_ptr.vmem [resolvable:$true] %s15_s10 }
   0x3   :  { %18 = dma.hbm_to_vmem [thread:$0]  %s14_s8, 256, %s16_s10, [#allocation3]  }
   0x4   :  { %100 = dma.done.wait [#allocation3], 256  }
   0x5   :  { %101 = vsyncadd [#allocation3], 4294967040  ;;  %v23_v0 = vld [vmem:[#allocation2] sm:$0xff]  ;;  %v24_v1 = vld [vmem:[#allocation2 + $0x8] sm:$0xff]  ;;  %s105_s11 = smov [#allocation5]   ;;  %s40_s15 = sshll.u32 %s123_s1, 4  ;;  %s41_s15 = int_to_ptr.hbm [resolvable:$true] %s40_s15 }
   0x6   :  { %s38_s12 = sshll.u32 %s105_s11, 4  ;;  %vm25_vm0 = vcmp.ge.f32.partialorder %v23_v0, 0.0  ;;  %v27_v2 = vmul.f32 0.01, %v23_v0  ;;  %vm26_vm1 = vcmp.ge.f32.partialorder %v24_v1, 0.0  ;;  %s39_s12 = int_to_ptr.vmem [resolvable:$true] %s38_s12 }
   0x7   :  { %v28_v3 = vmul.f32 0.01, %v24_v1 }
   0x8   :  { %v29_v4 = vsel %vm25_vm0, %v23_v0, %v27_v2 }
   0x9   :  { %v30_v5 = vsel %vm26_vm1, %v24_v1, %v28_v3  ;;  %31 = vst [vmem:[#allocation5] sm:$0xff] %v29_v4 }
   0xa   :  { %32 = vst [vmem:[#allocation5 + $0x8] sm:$0xff] %v30_v5 }
   0xb   :  { %43 = dma.vmem_to_hbm [thread:$0]  %s39_s12, 256, %s41_s15, [#allocation4]  }
   0xc   :  { %102 = dma.done.wait [#allocation4], 256  }
   0xd   :  { %103 = vsyncadd [#allocation4], 4294967040 }
   0xe   :  { %48 = vsyncpa [#allocation3], 1 }
   0xf   :  { %49 = vsyncpa [#allocation4], 1 }

</bundles_post_ra>
